<compile_context>
chip_gen: v6e
topology: v6e:2x2x1
jax: 0.10.0
libtpu: 0.0.40
codegen_flags: <defaults>
</compile_context>

<pallas_src>
import jax
import jax.numpy as jnp
from jax.experimental import pallas as pl
from jax.experimental.pallas import tpu as pltpu


# ----------------------------- Pallas kernel ------------------------------ #
def _make_dynamics_kernel(state_dim):
    def kernel(idx_ref,                       # scalar-prefetch (SMEM), used by index_maps
               x_ref,                         # [B, S+A]
               w1_ref, b1_ref,                # [1, S+A, H], [1, 1, H]
               w2_ref, b2_ref,                # [1, H, H],   [1, 1, H]
               wout_ref, bout_ref,            # [1, H, S+1], [1, 1, S+1]
               next_state_ref, reward_ref):   # [B, S], [B, 1]
        del idx_ref  # member selection happens in the BlockSpec index_maps

        x = x_ref[...]                                          # [B, S+A]

        # Layer 1: relu(x @ W1 + b1)   (fused W1, single MXU pass)
        h1 = jnp.maximum(
            jnp.dot(x, w1_ref[0], preferred_element_type=jnp.float32) + b1_ref[0],
            0.0)

        # Layer 2: relu(h1 @ W2 + b2)
        h2 = jnp.maximum(
            jnp.dot(h1, w2_ref[0], preferred_element_type=jnp.float32) + b2_ref[0],
            0.0)

        # Fused heads: one matmul producing [B, S+1] = [delta | reward]
        y = jnp.dot(h2, wout_ref[0], preferred_element_type=jnp.float32) + bout_ref[0]

        next_state_ref[...] = x[:, :state_dim] + y[:, :state_dim]   # residual
        reward_ref[...] = y[:, state_dim:]

    return kernel


# --------------------------- Pallas call wrapper --------------------------- #
def member_forward(x, stacked_params, idx, *, state_dim):
    """Run the MLP of the member selected by `idx` (shape (1,), int32)."""
    B, SA = x.shape
    H = stacked_params["w2"].shape[-1]
    S1 = stacked_params["wout"].shape[-1]   # state_dim + 1

    # index_maps receive (grid_idx, *scalar_prefetch_refs)
    def member_map(i, idx_ref):             # pick the chosen member's block
        return (idx_ref[0], 0, 0)

    def local_map(i, idx_ref):              # activations / outputs: single block
        return (0, 0)

    grid_spec = pltpu.PrefetchScalarGridSpec(
        num_scalar_prefetch=1,
        grid=(1,),
        in_specs=[
            pl.BlockSpec((B, SA), local_map),
            pl.BlockSpec((1, SA, H), member_map),
            pl.BlockSpec((1, 1, H), member_map),
            pl.BlockSpec((1, H, H), member_map),
            pl.BlockSpec((1, 1, H), member_map),
            pl.BlockSpec((1, H, S1), member_map),
            pl.BlockSpec((1, 1, S1), member_map),
        ],
        out_specs=(
            pl.BlockSpec((B, state_dim), local_map),
            pl.BlockSpec((B, 1), local_map),
        ),
    )

    return pl.pallas_call(
        _make_dynamics_kernel(state_dim),
        grid_spec=grid_spec,
        out_shape=(
            jax.ShapeDtypeStruct((B, state_dim), jnp.float32),   # next_state
            jax.ShapeDtypeStruct((B, 1), jnp.float32),           # reward
        ),
        compiler_params=pltpu.CompilerParams(
            dimension_semantics=("arbitrary",)),
    )(idx, x,
      stacked_params["w1"], stacked_params["b1"],
      stacked_params["w2"], stacked_params["b2"],
      stacked_params["wout"], stacked_params["bout"])


@jax.jit
def ensemble_forward(state, action, stacked_params, choice_key):
    """SimpleModelEnsemble.forward: pick a random member, run it (fully jitted)."""
    n_models = stacked_params["w1"].shape[0]
    state_dim = state.shape[1]
    # traced random index -> no device->host sync; consumed via scalar prefetch
    idx = jax.random.randint(choice_key, (1,), 0, n_models, dtype=jnp.int32)
    x = jnp.concatenate([state, action], axis=-1)
    return member_forward(x, stacked_params, idx, state_dim=state_dim)


# ------------------------ parameter init (synthetic) ----------------------- #
def init_ensemble_params(key, n_models, state_dim, action_dim, hidden):
    """Deterministic synthetic parameters, stacked along a leading model axis.

    Weights are stored fused: W1 = [W1_state; W1_action]  ([(S+A), H]) and
    W_out = [Ws | Wr]  ([H, S+1]), so the kernel does one matmul per layer.
    """
    def one_model(k):
        ks = jax.random.split(k, 5)
        scale = 0.05
        return {
            "w1":   scale * jax.random.normal(ks[0], (state_dim + action_dim, hidden), jnp.float32),
            "b1":   scale * jax.random.normal(ks[1], (1, hidden), jnp.float32),
            "w2":   scale * jax.random.normal(ks[2], (hidden, hidden), jnp.float32),
            "b2":   scale * jax.random.normal(ks[3], (1, hidden), jnp.float32),
            "wout": scale * jax.random.normal(ks[4], (hidden, state_dim + 1), jnp.float32),
            "bout": jnp.zeros((1, state_dim + 1), jnp.float32),
        }
    keys = jax.random.split(key, n_models)
    per_model = [one_model(k) for k in keys]
    # stack: each leaf -> [n_models, ...]
    return jax.tree_util.tree_map(lambda *xs: jnp.stack(xs, axis=0), *per_model)


# ----------------------------- reference (JAX) ----------------------------- #
def reference_forward(state, action, p):
    x = jnp.concatenate([state, action], axis=-1)
    h1 = jnp.maximum(x @ p["w1"] + p["b1"], 0.0)
    h2 = jnp.maximum(h1 @ p["w2"] + p["b2"], 0.0)
    y = h2 @ p["wout"] + p["bout"]
    S = state.shape[1]
    return state + y[:, :S], y[:, S:]


if __name__ == "__main__":
    key = jax.random.PRNGKey(0)
    k_params, k_state, k_action, k_choice = jax.random.split(key, 4)

    B, S, A, H, N_MODELS = 8, 16, 8, 128, 3

    stacked_params = init_ensemble_params(k_params, N_MODELS, S, A, H)
    state = jax.random.normal(k_state, (B, S), jnp.float32)
    action = jax.random.normal(k_action, (B, A), jnp.float32)

    next_state, reward = ensemble_forward(state, action, stacked_params, k_choice)
    next_state = jax.block_until_ready(next_state)
    reward = jax.block_until_ready(reward)

    # Correctness check against a pure-JAX reference for the chosen member.
    # (Host-side index pull here is test-harness only, not in the jitted path.)
    idx_val = int(jax.random.randint(k_choice, (1,), 0, N_MODELS, dtype=jnp.int32)[0])
    member = jax.tree_util.tree_map(lambda p: p[idx_val], stacked_params)
    ref_ns, ref_r = reference_forward(state, action, member)

    assert next_state.shape == (B, S) and reward.shape == (B, 1)
    assert jnp.allclose(next_state, ref_ns, rtol=1e-5, atol=1e-5)
    assert jnp.allclose(reward, ref_r, rtol=1e-5, atol=1e-5)

    print("KERNEL_OK")
</pallas_src>

<mosaic_0001>
module attributes {stable_mosaic.version = 11 : i64} {
  func.func @kernel(%arg0: i32, %arg1: memref<1xi32, #tpu.memory_space<smem>>, %arg2: memref<8x24xf32, #tpu.memory_space<vmem>>, %arg3: memref<1x24x128xf32, #tpu.memory_space<vmem>>, %arg4: memref<1x1x128xf32, #tpu.memory_space<vmem>>, %arg5: memref<1x128x128xf32, #tpu.memory_space<vmem>>, %arg6: memref<1x1x128xf32, #tpu.memory_space<vmem>>, %arg7: memref<1x128x17xf32, #tpu.memory_space<vmem>>, %arg8: memref<1x1x17xf32, #tpu.memory_space<vmem>>, %arg9: memref<8x16xf32, #tpu.memory_space<vmem>>, %arg10: memref<8x1xf32, #tpu.memory_space<vmem>>) attributes {dimension_semantics = [#tpu.dimension_semantics<arbitrary>], iteration_bounds = array<i64: 1>, scalar_prefetch = 1 : i64, scratch_operands = 0 : i64, tpu.core_type = #tpu.core_type<tc>, window_params = [{pipeline_mode = #tpu.pipeline_mode<synchronous>, transform_indices = @transform_0, window_bounds = array<i64: 8, 24>}, {transform_indices = @transform_1, window_bounds = array<i64: 1, 24, 128>}, {transform_indices = @transform_2, window_bounds = array<i64: 1, 1, 128>}, {transform_indices = @transform_3, window_bounds = array<i64: 1, 128, 128>}, {transform_indices = @transform_4, window_bounds = array<i64: 1, 1, 128>}, {transform_indices = @transform_5, window_bounds = array<i64: 1, 128, 17>}, {transform_indices = @transform_6, window_bounds = array<i64: 1, 1, 17>}, {pipeline_mode = #tpu.pipeline_mode<synchronous>, transform_indices = @transform_7, window_bounds = array<i64: 8, 16>}, {pipeline_mode = #tpu.pipeline_mode<synchronous>, transform_indices = @transform_8, window_bounds = array<i64: 8, 1>}]} {
    %c0 = arith.constant 0 : index
    %c0_0 = arith.constant 0 : index
    %0 = vector.load %arg2[%c0, %c0_0] : memref<8x24xf32, #tpu.memory_space<vmem>>, vector<8x24xf32>
    %c0_1 = arith.constant 0 : index
    %c0_2 = arith.constant 0 : index
    %c0_3 = arith.constant 0 : index
    %1 = vector.load %arg3[%c0_1, %c0_2, %c0_3] : memref<1x24x128xf32, #tpu.memory_space<vmem>>, vector<1x24x128xf32>
    %2 = vector.shape_cast %1 : vector<1x24x128xf32> to vector<24x128xf32>
    %cst = arith.constant dense<0.000000e+00> : vector<8x128xf32>
    %3 = tpu.matmul %0, %2, %cst {dimension_numbers = #tpu.dot_dimension_numbers<[1], [0], [0], [1], [0, 0, 1, 1], [], []>} : vector<8x24xf32>, vector<24x128xf32>, vector<8x128xf32> -> vector<8x128xf32>
    %c0_4 = arith.constant 0 : index
    %c0_5 = arith.constant 0 : index
    %c0_6 = arith.constant 0 : index
    %4 = vector.load %arg4[%c0_4, %c0_5, %c0_6] : memref<1x1x128xf32, #tpu.memory_space<vmem>>, vector<1x1x128xf32>
    %5 = vector.shape_cast %4 : vector<1x1x128xf32> to vector<1x128xf32>
    %6 = vector.broadcast %5 : vector<1x128xf32> to vector<8x128xf32>
    %7 = arith.addf %3, %6 : vector<8x128xf32>
    %cst_7 = arith.constant 0.000000e+00 : f32
    %8 = vector.broadcast %cst_7 : f32 to vector<8x128xf32>
    %9 = arith.maximumf %7, %8 : vector<8x128xf32>
    %c0_8 = arith.constant 0 : index
    %c0_9 = arith.constant 0 : index
    %c0_10 = arith.constant 0 : index
    %10 = vector.load %arg5[%c0_8, %c0_9, %c0_10] : memref<1x128x128xf32, #tpu.memory_space<vmem>>, vector<1x128x128xf32>
    %11 = vector.shape_cast %10 : vector<1x128x128xf32> to vector<128x128xf32>
    %cst_11 = arith.constant dense<0.000000e+00> : vector<8x128xf32>
    %12 = tpu.matmul %9, %11, %cst_11 {dimension_numbers = #tpu.dot_dimension_numbers<[1], [0], [0], [1], [0, 0, 1, 1], [], []>} : vector<8x128xf32>, vector<128x128xf32>, vector<8x128xf32> -> vector<8x128xf32>
    %c0_12 = arith.constant 0 : index
    %c0_13 = arith.constant 0 : index
    %c0_14 = arith.constant 0 : index
    %13 = vector.load %arg6[%c0_12, %c0_13, %c0_14] : memref<1x1x128xf32, #tpu.memory_space<vmem>>, vector<1x1x128xf32>
    %14 = vector.shape_cast %13 : vector<1x1x128xf32> to vector<1x128xf32>
    %15 = vector.broadcast %14 : vector<1x128xf32> to vector<8x128xf32>
    %16 = arith.addf %12, %15 : vector<8x128xf32>
    %cst_15 = arith.constant 0.000000e+00 : f32
    %17 = vector.broadcast %cst_15 : f32 to vector<8x128xf32>
    %18 = arith.maximumf %16, %17 : vector<8x128xf32>
    %c0_16 = arith.constant 0 : index
    %c0_17 = arith.constant 0 : index
    %c0_18 = arith.constant 0 : index
    %19 = vector.load %arg7[%c0_16, %c0_17, %c0_18] : memref<1x128x17xf32, #tpu.memory_space<vmem>>, vector<1x128x17xf32>
    %20 = vector.shape_cast %19 : vector<1x128x17xf32> to vector<128x17xf32>
    %cst_19 = arith.constant dense<0.000000e+00> : vector<8x17xf32>
    %21 = tpu.matmul %18, %20, %cst_19 {dimension_numbers = #tpu.dot_dimension_numbers<[1], [0], [0], [1], [0, 0, 1, 1], [], []>} : vector<8x128xf32>, vector<128x17xf32>, vector<8x17xf32> -> vector<8x17xf32>
    %c0_20 = arith.constant 0 : index
    %c0_21 = arith.constant 0 : index
    %c0_22 = arith.constant 0 : index
    %22 = vector.load %arg8[%c0_20, %c0_21, %c0_22] : memref<1x1x17xf32, #tpu.memory_space<vmem>>, vector<1x1x17xf32>
    %23 = vector.shape_cast %22 : vector<1x1x17xf32> to vector<1x17xf32>
    %24 = vector.broadcast %23 : vector<1x17xf32> to vector<8x17xf32>
    %25 = arith.addf %21, %24 : vector<8x17xf32>
    %26 = vector.extract_strided_slice %0 {offsets = [0, 0], sizes = [8, 16], strides = [1, 1]} : vector<8x24xf32> to vector<8x16xf32>
    %27 = vector.extract_strided_slice %25 {offsets = [0, 0], sizes = [8, 16], strides = [1, 1]} : vector<8x17xf32> to vector<8x16xf32>
    %28 = arith.addf %26, %27 : vector<8x16xf32>
    %c0_23 = arith.constant 0 : index
    %c0_24 = arith.constant 0 : index
    %29 = vector.load %arg9[%c0_23, %c0_24] : memref<8x16xf32, #tpu.memory_space<vmem>>, vector<8x16xf32>
    tpu.vector_store %arg9[%c0_23, %c0_24], %28 {strides = array<i32>} : memref<8x16xf32, #tpu.memory_space<vmem>>, vector<8x16xf32>,
    %30 = vector.extract_strided_slice %25 {offsets = [0, 16], sizes = [8, 1], strides = [1, 1]} : vector<8x17xf32> to vector<8x1xf32>
    %c0_25 = arith.constant 0 : index
    %c0_26 = arith.constant 0 : index
    %31 = vector.load %arg10[%c0_25, %c0_26] : memref<8x1xf32, #tpu.memory_space<vmem>>, vector<8x1xf32>
    tpu.vector_store %arg10[%c0_25, %c0_26], %30 {strides = array<i32>} : memref<8x1xf32, #tpu.memory_space<vmem>>, vector<8x1xf32>,
    return
  }
  func.func @transform_0(%arg0: i32, %arg1: memref<1xi32, #tpu.memory_space<smem>>) -> (i32, i32) {
    %c0_i32 = arith.constant 0 : i32
    %c0_i32_0 = arith.constant 0 : i32
    %c0_i32_1 = arith.constant 0 : i32
    return %c0_i32, %c0_i32_0 : i32, i32
  }
  func.func @transform_1(%arg0: i32, %arg1: memref<1xi32, #tpu.memory_space<smem>>) -> (i32, i32, i32) {
    %c0 = arith.constant 0 : index
    %0 = memref.load %arg1[%c0] : memref<1xi32, #tpu.memory_space<smem>>
    %c0_i32 = arith.constant 0 : i32
    %c0_i32_0 = arith.constant 0 : i32
    %c0_i32_1 = arith.constant 0 : i32
    return %0, %c0_i32, %c0_i32_0 : i32, i32, i32
  }
  func.func @transform_2(%arg0: i32, %arg1: memref<1xi32, #tpu.memory_space<smem>>) -> (i32, i32, i32) {
    %c0 = arith.constant 0 : index
    %0 = memref.load %arg1[%c0] : memref<1xi32, #tpu.memory_space<smem>>
    %c0_i32 = arith.constant 0 : i32
    %c0_i32_0 = arith.constant 0 : i32
    %c0_i32_1 = arith.constant 0 : i32
    return %0, %c0_i32, %c0_i32_0 : i32, i32, i32
  }
  func.func @transform_3(%arg0: i32, %arg1: memref<1xi32, #tpu.memory_space<smem>>) -> (i32, i32, i32) {
    %c0 = arith.constant 0 : index
    %0 = memref.load %arg1[%c0] : memref<1xi32, #tpu.memory_space<smem>>
    %c0_i32 = arith.constant 0 : i32
    %c0_i32_0 = arith.constant 0 : i32
    %c0_i32_1 = arith.constant 0 : i32
    return %0, %c0_i32, %c0_i32_0 : i32, i32, i32
  }
  func.func @transform_4(%arg0: i32, %arg1: memref<1xi32, #tpu.memory_space<smem>>) -> (i32, i32, i32) {
    %c0 = arith.constant 0 : index
    %0 = memref.load %arg1[%c0] : memref<1xi32, #tpu.memory_space<smem>>
    %c0_i32 = arith.constant 0 : i32
    %c0_i32_0 = arith.constant 0 : i32
    %c0_i32_1 = arith.constant 0 : i32
    return %0, %c0_i32, %c0_i32_0 : i32, i32, i32
  }
  func.func @transform_5(%arg0: i32, %arg1: memref<1xi32, #tpu.memory_space<smem>>) -> (i32, i32, i32) {
    %c0 = arith.constant 0 : index
    %0 = memref.load %arg1[%c0] : memref<1xi32, #tpu.memory_space<smem>>
    %c0_i32 = arith.constant 0 : i32
    %c0_i32_0 = arith.constant 0 : i32
    %c0_i32_1 = arith.constant 0 : i32
    return %0, %c0_i32, %c0_i32_0 : i32, i32, i32
  }
  func.func @transform_6(%arg0: i32, %arg1: memref<1xi32, #tpu.memory_space<smem>>) -> (i32, i32, i32) {
    %c0 = arith.constant 0 : index
    %0 = memref.load %arg1[%c0] : memref<1xi32, #tpu.memory_space<smem>>
    %c0_i32 = arith.constant 0 : i32
    %c0_i32_0 = arith.constant 0 : i32
    %c0_i32_1 = arith.constant 0 : i32
    return %0, %c0_i32, %c0_i32_0 : i32, i32, i32
  }
  func.func @transform_7(%arg0: i32, %arg1: memref<1xi32, #tpu.memory_space<smem>>) -> (i32, i32) {
    %c0_i32 = arith.constant 0 : i32
    %c0_i32_0 = arith.constant 0 : i32
    %c0_i32_1 = arith.constant 0 : i32
    return %c0_i32, %c0_i32_0 : i32, i32
  }
  func.func @transform_8(%arg0: i32, %arg1: memref<1xi32, #tpu.memory_space<smem>>) -> (i32, i32) {
    %c0_i32 = arith.constant 0 : i32
    %c0_i32_0 = arith.constant 0 : i32
    %c0_i32_1 = arith.constant 0 : i32
    return %c0_i32, %c0_i32_0 : i32, i32
  }
}

</mosaic_0001>

<bundles_post_ra>
// kernel: ensemble_forward.1
= control target key start
LH: loop header
LB: loop body
LE: loop exit
PB: predicated region body
PF: predicated region fallthrough
CT: control target
= control target key end

     0   :  { %v615_v0 = vmov 0.0   ;;  %vm616_vm0 = vmmov 0   ;;  %s794_s0 = inlined_call_operand.<no memory space> [shape: s32[1], index: 0, kind: input, shape index: {}]   ;;  %s795_s1 = inlined_call_operand.vmem [shape: f32[8,24], index: 1, kind: input, shape index: {}]   ;;  %s796_s2 = inlined_call_operand.vmem [shape: f32[3,24,128], index: 2, kind: input, shape index: {}]   ;;  %s797_s3 = inlined_call_operand.vmem [shape: f32[3,1,128], index: 3, kind: input, shape index: {}]   ;;  %s798_s4 = inlined_call_operand.vmem [shape: f32[3,128,128], index: 4, kind: input, shape index: {}]   ;;  %s799_s5 = inlined_call_operand.vmem [shape: f32[3,1,128], index: 5, kind: input, shape index: {}]   ;;  %s800_s6 = inlined_call_operand.vmem [shape: f32[3,128,17], index: 6, kind: input, shape index: {}]   ;;  %s801_s7 = inlined_call_operand.vmem [shape: f32[3,1,17], index: 7, kind: input, shape index: {}]   ;;  %s802_s8 = inlined_call_operand.hbm [shape: f32[8,16], index: 8, kind: output, shape index: {0}]   ;;  %s803_s9 = inlined_call_operand.vmem [shape: f32[8,1], index: 9, kind: output, shape index: {1}]  }
   0x1   :  { %p98_p0 = scmp.lt.s32.totalorder %s794_s0, 2  ;;  %509 = vmatprep.subr.mxu0 %v615_v0  ;;  %515 = vmatprep.mubr.msk.f32.mxu0 %vm616_vm0, %v615_v0 }
   0x2   :  { %16 = vsyncpa [#allocation5], 0  ;;  %518 = vmatprep.subr.mxu1 %v615_v0  ;;  %550 = vmatprep.mubr.msk.f32.mxu1 %vm616_vm0, %v615_v0  ;;  %v703_v7 = vld [vmem:[%s795_s1] sm:$0xff]  ;;  %vm144_vm1 = vcmask 195584   ;;  %s617_s30 = smov [#allocation4]   ;;  %vm407_vm2 = vcmask 130048  }
   0x3   :  { %s805_s0 = smov (!%p98_p0, %s794_s0), 2  ;;  %s421_s10 = sshll.u32 %s617_s30, 4  ;;  %s422_s10 = int_to_ptr.vmem [resolvable:$true] %s421_s10 }
   0x4   :  { %s588_s13 = smul.u32 24, %s805_s0  ;;  %s469_s14 = sshll.u32 %s805_s0, 7 }
   0x5   :  { %s690_s17 = scalar_lea.vmem %s798_s4, %s469_s14  ;;  %s740_s22 = scalar_lea.vmem %s800_s6, %s469_s14 }
   0x6   :  { %s102_s20 = scalar_lea.vmem %s796_s2, %s588_s13  ;;  %v234_v1 = vld [vmem:[%s690_s17 + $0x78] sm:$0xff]  ;;  %v233_v2 = vld [vmem:[%s690_s17 + $0x70] sm:$0xff]  ;;  %v232_v5 = vld [vmem:[%s690_s17 + $0x68] sm:$0xff]  ;;  %s107_s24 = scalar_lea.vmem %s797_s3, %s805_s0 }
   0x7   :  { %v136_v3 = vld [vmem:[%s102_s20 + $0x10] sm:$0xff]  ;;  %v135_v4 = vld [vmem:[%s102_s20 + $0x8] sm:$0xff]  ;;  %519 = vmatpush3.msra.mxu1 %v234_v1  ;;  %v134_v6 = vld [vmem:[%s102_s20] sm:$0xff]  ;;  %s119_s3 = scalar_lea.vmem %s799_s5, %s805_s0  ;;  %s131_s29 = scalar_lea.vmem %s801_s7, %s805_s0 }
   0x8   :  { %510 = vmatpush3.msra.mxu0 %v136_v3  ;;  %520 = vmatprep.subr.mxu1 %v615_v0  ;;  %v231_v8 = vld [vmem:[%s690_s17 + $0x60] sm:$0xff]  ;;  %v230_v9 = vld [vmem:[%s690_s17 + $0x58] sm:$0xff]  ;;  %v229_v10 = vld [vmem:[%s690_s17 + $0x50] sm:$0xff]  ;;  %s618_s5 = smov 112   ;;  %s593_s11 = scalar_lea.vmem %s422_s10, 128 }
   0x9   :  { %511 = vmatprep.subr.mxu0 %v615_v0  ;;  %521 = vmatpush3.msra.mxu1 %v233_v2  ;;  %v228_v11 = vld [vmem:[%s690_s17 + $0x48] sm:$0xff]  ;;  %v227_v12 = vld [vmem:[%s690_s17 + $0x40] sm:$0xff]  ;;  %v226_v13 = vld [vmem:[%s690_s17 + $0x38] sm:$0xff]  ;;  %p594_p1 = scmp.ne.s32.totalorder %s422_s10, %s593_s11  ;;  %p598_p2 = scmp.lt.s32.totalorder %s422_s10, %s422_s10 }
   0xa   :  { %512 = vmatpush3.msra.mxu0 %v135_v4  ;;  %522 = vmatprep.subr.mxu1 %v615_v0  ;;  %v225_v14 = vld [vmem:[%s690_s17 + $0x30] sm:$0xff]  ;;  %v224_v15 = vld [vmem:[%s690_s17 + $0x28] sm:$0xff]  ;;  %v223_v16 = vld [vmem:[%s690_s17 + $0x20] sm:$0xff]  ;;  %p599_p3 = scmp.lt.s32.totalorder %s593_s11, %s593_s11 }
   0xb   :  { %513 = vmatprep.subr.mxu0 %v615_v0  ;;  %523 = vmatpush3.msra.mxu1 %v232_v5  ;;  %v222_v17 = vld [vmem:[%s690_s17 + $0x18] sm:$0xff]  ;;  %v221_v18 = vld [vmem:[%s690_s17 + $0x10] sm:$0xff]  ;;  %v220_v19 = vld [vmem:[%s690_s17 + $0x8] sm:$0xff] }
   0xc   :  { %514 = vmatpush3.msra.mxu0 %v134_v6  ;;  %524 = vmatprep.subr.mxu1 %v615_v0  ;;  %v219_v20 = vld [vmem:[%s690_s17] sm:$0xff]  ;;  %v328_v21 = vld [vmem:[%s740_s22 + $0x78] sm:$0xff]  ;;  %v327_v22 = vld [vmem:[%s740_s22 + $0x70] sm:$0xff]  ;;  %p600_p4 = por %p599_p3, %p598_p2 }
   0xd   :  { %516 = vmatmul.mubr.msk.f32.vlgmr.msra.gmra.mxu0 %vm144_vm1, %v703_v7  ;;  %525 = vmatpush3.msra.mxu1 %v231_v8  ;;  %v326_v23 = vld [vmem:[%s740_s22 + $0x68] sm:$0xff]  ;;  %v325_v24 = vld [vmem:[%s740_s22 + $0x60] sm:$0xff]  ;;  %v324_v25 = vld [vmem:[%s740_s22 + $0x58] sm:$0xff] }
   0xe   :  { %526 = vmatprep.subr.mxu1 %v615_v0  ;;  %553 = vmatprep.subr.mxu0 %v615_v0  ;;  %v323_v26 = vld [vmem:[%s740_s22 + $0x50] sm:$0xff]  ;;  %v322_v27 = vld [vmem:[%s740_s22 + $0x48] sm:$0xff]  ;;  %v321_v28 = vld [vmem:[%s740_s22 + $0x40] sm:$0xff]  ;;  %p601_p5 = pnand %p600_p4, %p594_p1 }
   0xf   :  { %527 = vmatpush3.msra.mxu1 %v230_v9  ;;  %585 = vmatprep.mubr.msk.f32.mxu0 %vm616_vm0, %v615_v0  ;;  %v320_v29 = vld [vmem:[%s740_s22 + $0x38] sm:$0xff]  ;;  %v319_v30 = vld [vmem:[%s740_s22 + $0x30] sm:$0xff]  ;;  %v318_v31 = vld [vmem:[%s740_s22 + $0x28] sm:$0xff] }
  0x10   :  { %528 = vmatprep.subr.mxu1 %v615_v0  ;;  %554 = vmatpush3.msra.mxu0 %v328_v21  ;;  %v317_v32 = vld [vmem:[%s740_s22 + $0x20] sm:$0xff]  ;;  %v316_v33 = vld [vmem:[%s740_s22 + $0x18] sm:$0xff]  ;;  %v315_v39 = vld [vmem:[%s740_s22 + $0x10] sm:$0xff] }
  0x11   :  { %529 = vmatpush3.msra.mxu1 %v229_v10  ;;  %555 = vmatprep.subr.mxu0 %v615_v0  ;;  %v465_v34 = vld [vmem:[%s107_s24] ss:$0 sm:$0xff]  ;;  %v314_v40 = vld [vmem:[%s740_s22 + $0x8] sm:$0xff] }
  0x12   :  { %530 = vmatprep.subr.mxu1 %v615_v0  ;;  %556 = vmatpush3.msra.mxu0 %v327_v22  ;;  %v313_v41 = vld [vmem:[%s740_s22] sm:$0xff] }
  0x13   :  { %531 = vmatpush3.msra.mxu1 %v228_v11  ;;  %557 = vmatprep.subr.mxu0 %v615_v0  ;;  %v467_v42 = vld [vmem:[%s119_s3] ss:$0 sm:$0xff] }
  0x14   :  { %532 = vmatprep.subr.mxu1 %v615_v0  ;;  %558 = vmatpush3.msra.mxu0 %v326_v23  ;;  %v468_v47 = vld [vmem:[%s131_s29] ss:$0 sm:$0xff] }
  0x15   :  { %533 = vmatpush3.msra.mxu1 %v227_v12  ;;  %559 = vmatprep.subr.mxu0 %v615_v0 }
  0x16   :  { %534 = vmatprep.subr.mxu1 %v615_v0  ;;  %560 = vmatpush3.msra.mxu0 %v325_v24 }
  0x17   :  { %535 = vmatpush3.msra.mxu1 %v226_v13  ;;  %561 = vmatprep.subr.mxu0 %v615_v0 }
  0x18   :  { %536 = vmatprep.subr.mxu1 %v615_v0  ;;  %562 = vmatpush3.msra.mxu0 %v324_v25 }
  0x19   :  { %537 = vmatpush3.msra.mxu1 %v225_v14  ;;  %563 = vmatprep.subr.mxu0 %v615_v0 }
  0x1a   :  { %538 = vmatprep.subr.mxu1 %v615_v0  ;;  %564 = vmatpush3.msra.mxu0 %v323_v26 }
  0x1b   :  { %539 = vmatpush3.msra.mxu1 %v224_v15  ;;  %565 = vmatprep.subr.mxu0 %v615_v0 }
  0x1c   :  { %540 = vmatprep.subr.mxu1 %v615_v0  ;;  %566 = vmatpush3.msra.mxu0 %v322_v27 }
  0x1d   :  { %541 = vmatpush3.msra.mxu1 %v223_v16  ;;  %567 = vmatprep.subr.mxu0 %v615_v0 }
  0x1e   :  { %542 = vmatprep.subr.mxu1 %v615_v0  ;;  %568 = vmatpush3.msra.mxu0 %v321_v28 }
  0x1f   :  { %543 = vmatpush3.msra.mxu1 %v222_v17  ;;  %569 = vmatprep.subr.mxu0 %v615_v0 }
  0x20   :  { %544 = vmatprep.subr.mxu1 %v615_v0  ;;  %570 = vmatpush3.msra.mxu0 %v320_v29 }
  0x21   :  { %545 = vmatpush3.msra.mxu1 %v221_v18  ;;  %571 = vmatprep.subr.mxu0 %v615_v0 }
  0x22   :  { %546 = vmatprep.subr.mxu1 %v615_v0  ;;  %572 = vmatpush3.msra.mxu0 %v319_v30 }
  0x23   :  { %547 = vmatpush3.msra.mxu1 %v220_v19  ;;  %573 = vmatprep.subr.mxu0 %v615_v0 }
  0x24   :  { %548 = vmatprep.subr.mxu1 %v615_v0  ;;  %574 = vmatpush3.msra.mxu0 %v318_v31 }
  0x25   :  { %549 = vmatpush3.msra.mxu1 %v219_v20  ;;  %575 = vmatprep.subr.mxu0 %v615_v0 }
  0x26   :  { %576 = vmatpush3.msra.mxu0 %v317_v32 }
  0x27   :  { %577 = vmatprep.subr.mxu0 %v615_v0 }
  0x28   :  { %578 = vmatpush3.msra.mxu0 %v316_v33 }
  0x29   :  { %579 = vmatprep.subr.mxu0 %v615_v0 }
  0x2a   :  { %580 = vmatpush3.msra.mxu0 %v315_v39 }
  0x2b   :  { %581 = vmatprep.subr.mxu0 %v615_v0 }
  0x2c   :  { %582 = vmatpush3.msra.mxu0 %v314_v40 }
  0x2d   :  { %583 = vmatprep.subr.mxu0 %v615_v0 }
  0x2e   :  { %584 = vmatpush3.msra.mxu0 %v313_v41 }
  0xcd   :  { %v214_v35 = vpop.f32.mrf.mxu0 }
  0xce   :  { %v215_v36 = vadd.f32 %v465_v34, %v214_v35 }
  0xcf   :  { %v517_v37 = vpop.f32.mrf.mxu0 }
  0xd0   :  { %v218_v38 = vmax.f32 %v215_v36, 0.0 }
  0xd2   :  { %551 = vmatmul.mubr.f32.vlgmr.msra.gmra.mxu1 %v218_v38 }
 0x192   :  { %v308_v43 = vpop.f32.mrf.mxu1 }
 0x193   :  { %v309_v44 = vadd.f32 %v467_v42, %v308_v43 }
 0x194   :  { %v552_v45 = vpop.f32.mrf.mxu1 }
 0x195   :  { %v312_v46 = vmax.f32 %v309_v44, 0.0 }
 0x197   :  { %586 = vmatmul.mubr.f32.vlgmr.msra.gmra.mxu0 %v312_v46 }
 0x257   :  { %v402_v48 = vpop.f32.mrf.mxu0 }
 0x258   :  { %v403_v49 = vadd.f32 %v468_v47, %v402_v48 }
 0x259   :  { %v587_v50 = vpop.f32.mrf.mxu0 }
 0x25a   :  { %v406_v51 = vadd.f32 %v403_v49, %v703_v7  ;;  %410 = vrot.lane.b32.xlu0 %v403_v49, %s618_s5 }
 0x25c   :  { %408 = vst.msk [vmem:[#allocation4] sm:$0xff] %vm407_vm2, %v406_v51 }
 0x25d   :  { %604 = shalt.err (!%p601_p5)
}
 0x25e   :  { %424 = dma.vmem_to_hbm [thread:$0]  %s422_s10, 128, %s802_s8, [#allocation5]   ;;  %vm413_vm3 = vcmask 7168  }
 0x2cc   :  { %v411_v52 = vpop.permute.xlu0 %410 }
 0x2cd   :  { %414 = vst.msk [vmem:[%s803_s9] sm:$0xff] %vm413_vm3, %v411_v52 }
 0x2ce   :  { %613 = dma.done.wait [#allocation5], 128  }
 0x2cf   :  { %614 = vsyncadd [#allocation5], 4294967168 }
 0x2d0   :  { %432 = vsyncpa [#allocation5], 1 }

</bundles_post_ra>
